<compile_context>
chip_gen: v6e
topology: v6e:2x2x1
jax: 0.10.0
libtpu: 0.0.40
codegen_flags: <defaults>
</compile_context>

<pallas_src>
import functools

import jax
import jax.numpy as jnp
from jax.experimental import pallas as pl
from jax.experimental.pallas import tpu as pltpu


# ---------------------------- Pallas kernel ---------------------------------
def nnet_kernel(ids_ref, tbl_ref, whh_ref,
                w1_ref, b1_ref, w2_ref, b2_ref,
                o_ref):
    # ids_ref : (T*B, 1)  int32  time-major token ids (row t*B + b)
    # tbl_ref : (Vp, 4H)  f32    emb @ W_ih^T + (b_ih + b_hh), gate order (i,f,o,g)
    # whh_ref : (H, 4H)   f32
    # w1_ref  : (H, F)    b1_ref : (1, F)   w2_ref : (F, Op)   b2_ref : (1, Op)
    # o_ref   : (B, Op)
    B, _ = o_ref.shape
    TB = ids_ref.shape[0]
    T = TB // B
    H = whh_ref.shape[0]
    Vp = tbl_ref.shape[0]

    # ---- fused gather + input projection + bias: single MXU op ----------------
    # Each one-hot row selects exactly one table row, so the bias folded into the
    # table is added exactly once per (t, b).
    lane_ids = jax.lax.broadcasted_iota(jnp.int32, (TB, Vp), 1)
    onehot = (lane_ids == ids_ref[...]).astype(jnp.float32)          # (TB, Vp)
    xg = jnp.dot(onehot, tbl_ref[...],
                 preferred_element_type=jnp.float32)                 # (TB, 4H)

    # ---- LSTM recurrence, fully unrolled (T static) ----------------------------
    h = jnp.zeros((B, H), jnp.float32)
    c = jnp.zeros((B, H), jnp.float32)
    hmax = jnp.full((B, H), -jnp.inf, jnp.float32)
    for t in range(T):
        gates = xg[t * B:(t + 1) * B, :] + jnp.dot(
            h, whh_ref[...], preferred_element_type=jnp.float32)     # (B, 4H)
        sig = jax.nn.sigmoid(gates[:, :3 * H])           # i, f, o : one EUP pass
        g_g = jnp.tanh(gates[:, 3 * H:])                 # g       : one EUP pass
        i_g = sig[:, 0 * H:1 * H]
        f_g = sig[:, 1 * H:2 * H]
        o_g = sig[:, 2 * H:3 * H]
        c = f_g * c + i_g * g_g
        h = o_g * jnp.tanh(c)
        hmax = jnp.maximum(hmax, h)                      # running max over time

    # ---- fc1 + relu + fc2 (lane-dense padded widths, unmasked output store) ----
    a4 = jnp.maximum(
        jnp.dot(hmax, w1_ref[...], preferred_element_type=jnp.float32)
        + b1_ref[...], 0.0)
    a5 = jnp.dot(a4, w2_ref[...], preferred_element_type=jnp.float32) + b2_ref[...]
    o_ref[...] = a5.astype(o_ref.dtype)


# ------------------------------ wrapper --------------------------------------
@functools.partial(jax.jit, static_argnums=2)
def nnet_forward(text, kparams, output_dim):
    B, T = text.shape
    Op = kparams["w2_T"].shape[1]

    B_pad = -(-B // 8) * 8                               # sublane-align the batch
    ids = jnp.pad(text.astype(jnp.int32), ((0, B_pad - B), (0, 0)))   # pad rows -> token 0
    ids_tb = ids.T.reshape(T * B_pad, 1)                 # time-major: row = t*B + b

    vmem = pl.BlockSpec(memory_space=pltpu.MemorySpace.VMEM)
    out = pl.pallas_call(
        nnet_kernel,
        out_shape=jax.ShapeDtypeStruct((B_pad, Op), jnp.float32),
        in_specs=[vmem] * 7,
        out_specs=vmem,
    )(ids_tb, kparams["tbl_g"], kparams["w_hh_T"],
      kparams["w1_T"], kparams["b1"], kparams["w2_T"], kparams["b2"])
    return out[:B, :output_dim]


# ------------------------- parameters (PyTorch layout) ------------------------
def init_raw_params(key, vocab_size, embedding_dim, output_dim, pad_idx, lstm_hidden_size):
    """Raw parameters exactly as nn.Embedding / nn.LSTM / nn.Linear hold them."""
    E, H, O = embedding_dim, lstm_hidden_size, output_dim
    ks = jax.random.split(key, 9)
    u = lambda k, shape, bound: jax.random.uniform(k, shape, jnp.float32, -bound, bound)

    emb = jax.random.normal(ks[0], (vocab_size, E), jnp.float32)
    emb = emb.at[pad_idx].set(0.0)                       # nn.Embedding zeros the padding row

    s = 1.0 / jnp.sqrt(H)
    w_ih = u(ks[1], (4 * H, E), s)                       # gate order (i, f, g, o)
    w_hh = u(ks[2], (4 * H, H), s)
    b_ih = u(ks[3], (4 * H,), s)
    b_hh = u(ks[4], (4 * H,), s)

    w1 = u(ks[5], (50, H), s)
    b1 = u(ks[6], (50,), s)
    s2 = 1.0 / jnp.sqrt(50.0)
    w2 = u(ks[7], (O, 50), s2)
    b2 = u(ks[8], (O,), s2)
    return dict(emb=emb, w_ih=w_ih, w_hh=w_hh, b_ih=b_ih, b_hh=b_hh,
                w1=w1, b1=b1, w2=w2, b2=b2)


def prepare_kernel_params(raw, *, fc_pad=128, out_pad=128):
    """Kernel layout: (i,f,o,g) gate order, W_ih/bias folded into the gather table,
    transposed weights, FC widths padded to 128 lanes."""
    H = raw["w_hh"].shape[1]
    O = raw["w2"].shape[0]
    F = raw["w1"].shape[0]                               # 50
    V, _ = raw["emb"].shape

    def regroup(m):                                      # rows (i,f,g,o) -> (i,f,o,g)
        i, f, g, o = m[0:H], m[H:2 * H], m[2 * H:3 * H], m[3 * H:4 * H]
        return jnp.concatenate([i, f, o, g], axis=0)

    w_ih_T = regroup(raw["w_ih"]).T                      # (E, 4H)
    w_hh_T = regroup(raw["w_hh"]).T                      # (H, 4H)
    bias = regroup(raw["b_ih"] + raw["b_hh"]).reshape(1, 4 * H)

    # Fold gather + input projection + bias into one prep-time table:
    # one_hot(token) @ tbl == emb[token] @ W_ih^T + (b_ih + b_hh).
    Vp = -(-V // 128) * 128
    tbl = raw["emb"] @ w_ih_T + bias                     # (V, 4H)
    tbl_g = jnp.zeros((Vp, 4 * H), jnp.float32).at[:V, :].set(tbl)

    w1_T = jnp.zeros((H, fc_pad), jnp.float32).at[:, :F].set(raw["w1"].T)
    b1 = jnp.zeros((1, fc_pad), jnp.float32).at[:, :F].set(raw["b1"])
    w2_T = jnp.zeros((fc_pad, out_pad), jnp.float32).at[:F, :O].set(raw["w2"].T)
    b2 = jnp.zeros((1, out_pad), jnp.float32).at[:, :O].set(raw["b2"])

    return dict(tbl_g=tbl_g, w_hh_T=w_hh_T,
                w1_T=w1_T, b1=b1, w2_T=w2_T, b2=b2)


# --------------------------- pure-JAX reference ------------------------------
def nnet_reference(text, raw):
    emb = raw["emb"][text]                               # (B, T, E)
    B, T, _ = emb.shape
    H = raw["w_hh"].shape[1]
    h = jnp.zeros((B, H), jnp.float32)
    c = jnp.zeros((B, H), jnp.float32)
    hs = []
    for t in range(T):
        gates = (emb[:, t, :] @ raw["w_ih"].T + raw["b_ih"]
                 + h @ raw["w_hh"].T + raw["b_hh"])
        i_g = jax.nn.sigmoid(gates[:, 0 * H:1 * H])
        f_g = jax.nn.sigmoid(gates[:, 1 * H:2 * H])
        g_g = jnp.tanh(gates[:, 2 * H:3 * H])
        o_g = jax.nn.sigmoid(gates[:, 3 * H:4 * H])
        c = f_g * c + i_g * g_g
        h = o_g * jnp.tanh(c)
        hs.append(h)
    hmax = jnp.max(jnp.stack(hs, axis=1), axis=1)        # MaxPool2d((T,1)).squeeze(1)
    a4 = jnp.maximum(hmax @ raw["w1"].T + raw["b1"], 0.0)
    return a4 @ raw["w2"].T + raw["b2"]


# -------------------------------- main ----------------------------------------
if __name__ == "__main__":
    vocab_size = 100
    embedding_dim = 32
    output_dim = 4
    pad_idx = 0
    text_length = 8
    lstm_hidden_size = 32
    batch = 2

    key = jax.random.PRNGKey(0)
    k_params, k_text = jax.random.split(key)
    raw = init_raw_params(k_params, vocab_size, embedding_dim, output_dim,
                          pad_idx, lstm_hidden_size)
    kparams = prepare_kernel_params(raw)
    text = jax.random.randint(k_text, (batch, text_length), 0, vocab_size, jnp.int32)

    out = nnet_forward(text, kparams, output_dim)
    out = jax.block_until_ready(out)

    ref = nnet_reference(text, raw)
    assert out.shape == (batch, output_dim)
    assert jnp.allclose(out, ref, rtol=2e-3, atol=2e-3), "mismatch vs JAX reference"

    print("KERNEL_OK")
</pallas_src>

<mosaic_0001>
module attributes {stable_mosaic.version = 11 : i64} {
  func.func @nnet_kernel(%arg0: memref<64x1xi32, #tpu.memory_space<vmem>>, %arg1: memref<128x128xf32, #tpu.memory_space<vmem>>, %arg2: memref<32x128xf32, #tpu.memory_space<vmem>>, %arg3: memref<32x128xf32, #tpu.memory_space<vmem>>, %arg4: memref<1x128xf32, #tpu.memory_space<vmem>>, %arg5: memref<128x128xf32, #tpu.memory_space<vmem>>, %arg6: memref<1x128xf32, #tpu.memory_space<vmem>>, %arg7: memref<8x128xf32, #tpu.memory_space<vmem>>) attributes {dimension_semantics = [], scalar_prefetch = 0 : i64, scratch_operands = 0 : i64, tpu.core_type = #tpu.core_type<tc>} {
    %0 = tpu.iota {dimensions = array<i32: 1>} : vector<64x128xi32>
    %c0 = arith.constant 0 : index
    %c0_0 = arith.constant 0 : index
    %1 = vector.load %arg0[%c0, %c0_0] : memref<64x1xi32, #tpu.memory_space<vmem>>, vector<64x1xi32>
    %2 = vector.broadcast %1 : vector<64x1xi32> to vector<64x128xi32>
    %3 = arith.cmpi eq, %0, %2 : vector<64x128xi32>
    %4 = arith.extui %3 : vector<64x128xi1> to vector<64x128xi32>
    %5 = arith.sitofp %4 : vector<64x128xi32> to vector<64x128xf32>
    %c0_1 = arith.constant 0 : index
    %c0_2 = arith.constant 0 : index
    %6 = vector.load %arg1[%c0_1, %c0_2] : memref<128x128xf32, #tpu.memory_space<vmem>>, vector<128x128xf32>
    %cst = arith.constant dense<0.000000e+00> : vector<64x128xf32>
    %7 = tpu.matmul %5, %6, %cst {dimension_numbers = #tpu.dot_dimension_numbers<[1], [0], [0], [1], [0, 0, 1, 1], [], []>} : vector<64x128xf32>, vector<128x128xf32>, vector<64x128xf32> -> vector<64x128xf32>
    %cst_3 = arith.constant 0.000000e+00 : f32
    %8 = vector.broadcast %cst_3 : f32 to vector<8x32xf32>
    %cst_4 = arith.constant 0.000000e+00 : f32
    %9 = vector.broadcast %cst_4 : f32 to vector<8x32xf32>
    %cst_5 = arith.constant 0xFF800000 : f32
    %10 = vector.broadcast %cst_5 : f32 to vector<8x32xf32>
    %11 = vector.extract_strided_slice %7 {offsets = [0, 0], sizes = [8, 128], strides = [1, 1]} : vector<64x128xf32> to vector<8x128xf32>
    %c0_6 = arith.constant 0 : index
    %c0_7 = arith.constant 0 : index
    %12 = vector.load %arg2[%c0_6, %c0_7] : memref<32x128xf32, #tpu.memory_space<vmem>>, vector<32x128xf32>
    %cst_8 = arith.constant dense<0.000000e+00> : vector<8x128xf32>
    %13 = tpu.matmul %8, %12, %cst_8 {dimension_numbers = #tpu.dot_dimension_numbers<[1], [0], [0], [1], [0, 0, 1, 1], [], []>} : vector<8x32xf32>, vector<32x128xf32>, vector<8x128xf32> -> vector<8x128xf32>
    %14 = arith.addf %11, %13 : vector<8x128xf32>
    %15 = vector.extract_strided_slice %14 {offsets = [0, 0], sizes = [8, 96], strides = [1, 1]} : vector<8x128xf32> to vector<8x96xf32>
    %16 = arith.negf %15 : vector<8x96xf32>
    %17 = math.exp %16 : vector<8x96xf32>
    %cst_9 = arith.constant 1.000000e+00 : f32
    %18 = vector.broadcast %cst_9 : f32 to vector<8x96xf32>
    %19 = arith.addf %18, %17 : vector<8x96xf32>
    %20 = arith.divf %18, %19 : vector<8x96xf32>
    %21 = vector.extract_strided_slice %14 {offsets = [0, 96], sizes = [8, 32], strides = [1, 1]} : vector<8x128xf32> to vector<8x32xf32>
    %22 = math.tanh %21 : vector<8x32xf32>
    %23 = vector.extract_strided_slice %20 {offsets = [0, 0], sizes = [8, 32], strides = [1, 1]} : vector<8x96xf32> to vector<8x32xf32>
    %24 = vector.extract_strided_slice %20 {offsets = [0, 32], sizes = [8, 32], strides = [1, 1]} : vector<8x96xf32> to vector<8x32xf32>
    %25 = vector.extract_strided_slice %20 {offsets = [0, 64], sizes = [8, 32], strides = [1, 1]} : vector<8x96xf32> to vector<8x32xf32>
    %26 = arith.mulf %24, %9 : vector<8x32xf32>
    %27 = arith.mulf %23, %22 : vector<8x32xf32>
    %28 = arith.addf %26, %27 : vector<8x32xf32>
    %29 = math.tanh %28 : vector<8x32xf32>
    %30 = arith.mulf %25, %29 : vector<8x32xf32>
    %31 = arith.maximumf %10, %30 : vector<8x32xf32>
    %32 = vector.extract_strided_slice %7 {offsets = [8, 0], sizes = [8, 128], strides = [1, 1]} : vector<64x128xf32> to vector<8x128xf32>
    %c0_10 = arith.constant 0 : index
    %c0_11 = arith.constant 0 : index
    %33 = vector.load %arg2[%c0_10, %c0_11] : memref<32x128xf32, #tpu.memory_space<vmem>>, vector<32x128xf32>
    %cst_12 = arith.constant dense<0.000000e+00> : vector<8x128xf32>
    %34 = tpu.matmul %30, %33, %cst_12 {dimension_numbers = #tpu.dot_dimension_numbers<[1], [0], [0], [1], [0, 0, 1, 1], [], []>} : vector<8x32xf32>, vector<32x128xf32>, vector<8x128xf32> -> vector<8x128xf32>
    %35 = arith.addf %32, %34 : vector<8x128xf32>
    %36 = vector.extract_strided_slice %35 {offsets = [0, 0], sizes = [8, 96], strides = [1, 1]} : vector<8x128xf32> to vector<8x96xf32>
    %37 = arith.negf %36 : vector<8x96xf32>
    %38 = math.exp %37 : vector<8x96xf32>
    %cst_13 = arith.constant 1.000000e+00 : f32
    %39 = vector.broadcast %cst_13 : f32 to vector<8x96xf32>
    %40 = arith.addf %39, %38 : vector<8x96xf32>
    %41 = arith.divf %39, %40 : vector<8x96xf32>
    %42 = vector.extract_strided_slice %35 {offsets = [0, 96], sizes = [8, 32], strides = [1, 1]} : vector<8x128xf32> to vector<8x32xf32>
    %43 = math.tanh %42 : vector<8x32xf32>
    %44 = vector.extract_strided_slice %41 {offsets = [0, 0], sizes = [8, 32], strides = [1, 1]} : vector<8x96xf32> to vector<8x32xf32>
    %45 = vector.extract_strided_slice %41 {offsets = [0, 32], sizes = [8, 32], strides = [1, 1]} : vector<8x96xf32> to vector<8x32xf32>
    %46 = vector.extract_strided_slice %41 {offsets = [0, 64], sizes = [8, 32], strides = [1, 1]} : vector<8x96xf32> to vector<8x32xf32>
    %47 = arith.mulf %45, %28 : vector<8x32xf32>
    %48 = arith.mulf %44, %43 : vector<8x32xf32>
    %49 = arith.addf %47, %48 : vector<8x32xf32>
    %50 = math.tanh %49 : vector<8x32xf32>
    %51 = arith.mulf %46, %50 : vector<8x32xf32>
    %52 = arith.maximumf %31, %51 : vector<8x32xf32>
    %53 = vector.extract_strided_slice %7 {offsets = [16, 0], sizes = [8, 128], strides = [1, 1]} : vector<64x128xf32> to vector<8x128xf32>
    %c0_14 = arith.constant 0 : index
    %c0_15 = arith.constant 0 : index
    %54 = vector.load %arg2[%c0_14, %c0_15] : memref<32x128xf32, #tpu.memory_space<vmem>>, vector<32x128xf32>
    %cst_16 = arith.constant dense<0.000000e+00> : vector<8x128xf32>
    %55 = tpu.matmul %51, %54, %cst_16 {dimension_numbers = #tpu.dot_dimension_numbers<[1], [0], [0], [1], [0, 0, 1, 1], [], []>} : vector<8x32xf32>, vector<32x128xf32>, vector<8x128xf32> -> vector<8x128xf32>
    %56 = arith.addf %53, %55 : vector<8x128xf32>
    %57 = vector.extract_strided_slice %56 {offsets = [0, 0], sizes = [8, 96], strides = [1, 1]} : vector<8x128xf32> to vector<8x96xf32>
    %58 = arith.negf %57 : vector<8x96xf32>
    %59 = math.exp %58 : vector<8x96xf32>
    %cst_17 = arith.constant 1.000000e+00 : f32
    %60 = vector.broadcast %cst_17 : f32 to vector<8x96xf32>
    %61 = arith.addf %60, %59 : vector<8x96xf32>
    %62 = arith.divf %60, %61 : vector<8x96xf32>
    %63 = vector.extract_strided_slice %56 {offsets = [0, 96], sizes = [8, 32], strides = [1, 1]} : vector<8x128xf32> to vector<8x32xf32>
    %64 = math.tanh %63 : vector<8x32xf32>
    %65 = vector.extract_strided_slice %62 {offsets = [0, 0], sizes = [8, 32], strides = [1, 1]} : vector<8x96xf32> to vector<8x32xf32>
    %66 = vector.extract_strided_slice %62 {offsets = [0, 32], sizes = [8, 32], strides = [1, 1]} : vector<8x96xf32> to vector<8x32xf32>
    %67 = vector.extract_strided_slice %62 {offsets = [0, 64], sizes = [8, 32], strides = [1, 1]} : vector<8x96xf32> to vector<8x32xf32>
    %68 = arith.mulf %66, %49 : vector<8x32xf32>
    %69 = arith.mulf %65, %64 : vector<8x32xf32>
    %70 = arith.addf %68, %69 : vector<8x32xf32>
    %71 = math.tanh %70 : vector<8x32xf32>
    %72 = arith.mulf %67, %71 : vector<8x32xf32>
    %73 = arith.maximumf %52, %72 : vector<8x32xf32>
    %74 = vector.extract_strided_slice %7 {offsets = [24, 0], sizes = [8, 128], strides = [1, 1]} : vector<64x128xf32> to vector<8x128xf32>
    %c0_18 = arith.constant 0 : index
    %c0_19 = arith.constant 0 : index
    %75 = vector.load %arg2[%c0_18, %c0_19] : memref<32x128xf32, #tpu.memory_space<vmem>>, vector<32x128xf32>
    %cst_20 = arith.constant dense<0.000000e+00> : vector<8x128xf32>
    %76 = tpu.matmul %72, %75, %cst_20 {dimension_numbers = #tpu.dot_dimension_numbers<[1], [0], [0], [1], [0, 0, 1, 1], [], []>} : vector<8x32xf32>, vector<32x128xf32>, vector<8x128xf32> -> vector<8x128xf32>
    %77 = arith.addf %74, %76 : vector<8x128xf32>
    %78 = vector.extract_strided_slice %77 {offsets = [0, 0], sizes = [8, 96], strides = [1, 1]} : vector<8x128xf32> to vector<8x96xf32>
    %79 = arith.negf %78 : vector<8x96xf32>
    %80 = math.exp %79 : vector<8x96xf32>
    %cst_21 = arith.constant 1.000000e+00 : f32
    %81 = vector.broadcast %cst_21 : f32 to vector<8x96xf32>
    %82 = arith.addf %81, %80 : vector<8x96xf32>
    %83 = arith.divf %81, %82 : vector<8x96xf32>
    %84 = vector.extract_strided_slice %77 {offsets = [0, 96], sizes = [8, 32], strides = [1, 1]} : vector<8x128xf32> to vector<8x32xf32>
    %85 = math.tanh %84 : vector<8x32xf32>
    %86 = vector.extract_strided_slice %83 {offsets = [0, 0], sizes = [8, 32], strides = [1, 1]} : vector<8x96xf32> to vector<8x32xf32>
    %87 = vector.extract_strided_slice %83 {offsets = [0, 32], sizes = [8, 32], strides = [1, 1]} : vector<8x96xf32> to vector<8x32xf32>
    %88 = vector.extract_strided_slice %83 {offsets = [0, 64], sizes = [8, 32], strides = [1, 1]} : vector<8x96xf32> to vector<8x32xf32>
    %89 = arith.mulf %87, %70 : vector<8x32xf32>
    %90 = arith.mulf %86, %85 : vector<8x32xf32>
    %91 = arith.addf %89, %90 : vector<8x32xf32>
    %92 = math.tanh %91 : vector<8x32xf32>
    %93 = arith.mulf %88, %92 : vector<8x32xf32>
    %94 = arith.maximumf %73, %93 : vector<8x32xf32>
    %95 = vector.extract_strided_slice %7 {offsets = [32, 0], sizes = [8, 128], strides = [1, 1]} : vector<64x128xf32> to vector<8x128xf32>
    %c0_22 = arith.constant 0 : index
    %c0_23 = arith.constant 0 : index
    %96 = vector.load %arg2[%c0_22, %c0_23] : memref<32x128xf32, #tpu.memory_space<vmem>>, vector<32x128xf32>
    %cst_24 = arith.constant dense<0.000000e+00> : vector<8x128xf32>
    %97 = tpu.matmul %93, %96, %cst_24 {dimension_numbers = #tpu.dot_dimension_numbers<[1], [0], [0], [1], [0, 0, 1, 1], [], []>} : vector<8x32xf32>, vector<32x128xf32>, vector<8x128xf32> -> vector<8x128xf32>
    %98 = arith.addf %95, %97 : vector<8x128xf32>
    %99 = vector.extract_strided_slice %98 {offsets = [0, 0], sizes = [8, 96], strides = [1, 1]} : vector<8x128xf32> to vector<8x96xf32>
    %100 = arith.negf %99 : vector<8x96xf32>
    %101 = math.exp %100 : vector<8x96xf32>
    %cst_25 = arith.constant 1.000000e+00 : f32
    %102 = vector.broadcast %cst_25 : f32 to vector<8x96xf32>
    %103 = arith.addf %102, %101 : vector<8x96xf32>
    %104 = arith.divf %102, %103 : vector<8x96xf32>
    %105 = vector.extract_strided_slice %98 {offsets = [0, 96], sizes = [8, 32], strides = [1, 1]} : vector<8x128xf32> to vector<8x32xf32>
    %106 = math.tanh %105 : vector<8x32xf32>
    %107 = vector.extract_strided_slice %104 {offsets = [0, 0], sizes = [8, 32], strides = [1, 1]} : vector<8x96xf32> to vector<8x32xf32>
    %108 = vector.extract_strided_slice %104 {offsets = [0, 32], sizes = [8, 32], strides = [1, 1]} : vector<8x96xf32> to vector<8x32xf32>
    %109 = vector.extract_strided_slice %104 {offsets = [0, 64], sizes = [8, 32], strides = [1, 1]} : vector<8x96xf32> to vector<8x32xf32>
    %110 = arith.mulf %108, %91 : vector<8x32xf32>
    %111 = arith.mulf %107, %106 : vector<8x32xf32>
    %112 = arith.addf %110, %111 : vector<8x32xf32>
    %113 = math.tanh %112 : vector<8x32xf32>
    %114 = arith.mulf %109, %113 : vector<8x32xf32>
    %115 = arith.maximumf %94, %114 : vector<8x32xf32>
    %116 = vector.extract_strided_slice %7 {offsets = [40, 0], sizes = [8, 128], strides = [1, 1]} : vector<64x128xf32> to vector<8x128xf32>
    %c0_26 = arith.constant 0 : index
    %c0_27 = arith.constant 0 : index
    %117 = vector.load %arg2[%c0_26, %c0_27] : memref<32x128xf32, #tpu.memory_space<vmem>>, vector<32x128xf32>
    %cst_28 = arith.constant dense<0.000000e+00> : vector<8x128xf32>
    %118 = tpu.matmul %114, %117, %cst_28 {dimension_numbers = #tpu.dot_dimension_numbers<[1], [0], [0], [1], [0, 0, 1, 1], [], []>} : vector<8x32xf32>, vector<32x128xf32>, vector<8x128xf32> -> vector<8x128xf32>
    %119 = arith.addf %116, %118 : vector<8x128xf32>
    %120 = vector.extract_strided_slice %119 {offsets = [0, 0], sizes = [8, 96], strides = [1, 1]} : vector<8x128xf32> to vector<8x96xf32>
    %121 = arith.negf %120 : vector<8x96xf32>
    %122 = math.exp %121 : vector<8x96xf32>
    %cst_29 = arith.constant 1.000000e+00 : f32
    %123 = vector.broadcast %cst_29 : f32 to vector<8x96xf32>
    %124 = arith.addf %123, %122 : vector<8x96xf32>
    %125 = arith.divf %123, %124 : vector<8x96xf32>
    %126 = vector.extract_strided_slice %119 {offsets = [0, 96], sizes = [8, 32], strides = [1, 1]} : vector<8x128xf32> to vector<8x32xf32>
    %127 = math.tanh %126 : vector<8x32xf32>
    %128 = vector.extract_strided_slice %125 {offsets = [0, 0], sizes = [8, 32], strides = [1, 1]} : vector<8x96xf32> to vector<8x32xf32>
    %129 = vector.extract_strided_slice %125 {offsets = [0, 32], sizes = [8, 32], strides = [1, 1]} : vector<8x96xf32> to vector<8x32xf32>
    %130 = vector.extract_strided_slice %125 {offsets = [0, 64], sizes = [8, 32], strides = [1, 1]} : vector<8x96xf32> to vector<8x32xf32>
    %131 = arith.mulf %129, %112 : vector<8x32xf32>
    %132 = arith.mulf %128, %127 : vector<8x32xf32>
    %133 = arith.addf %131, %132 : vector<8x32xf32>
    %134 = math.tanh %133 : vector<8x32xf32>
    %135 = arith.mulf %130, %134 : vector<8x32xf32>
    %136 = arith.maximumf %115, %135 : vector<8x32xf32>
    %137 = vector.extract_strided_slice %7 {offsets = [48, 0], sizes = [8, 128], strides = [1, 1]} : vector<64x128xf32> to vector<8x128xf32>
    %c0_30 = arith.constant 0 : index
    %c0_31 = arith.constant 0 : index
    %138 = vector.load %arg2[%c0_30, %c0_31] : memref<32x128xf32, #tpu.memory_space<vmem>>, vector<32x128xf32>
    %cst_32 = arith.constant dense<0.000000e+00> : vector<8x128xf32>
    %139 = tpu.matmul %135, %138, %cst_32 {dimension_numbers = #tpu.dot_dimension_numbers<[1], [0], [0], [1], [0, 0, 1, 1], [], []>} : vector<8x32xf32>, vector<32x128xf32>, vector<8x128xf32> -> vector<8x128xf32>
    %140 = arith.addf %137, %139 : vector<8x128xf32>
    %141 = vector.extract_strided_slice %140 {offsets = [0, 0], sizes = [8, 96], strides = [1, 1]} : vector<8x128xf32> to vector<8x96xf32>
    %142 = arith.negf %141 : vector<8x96xf32>
    %143 = math.exp %142 : vector<8x96xf32>
    %cst_33 = arith.constant 1.000000e+00 : f32
    %144 = vector.broadcast %cst_33 : f32 to vector<8x96xf32>
    %145 = arith.addf %144, %143 : vector<8x96xf32>
    %146 = arith.divf %144, %145 : vector<8x96xf32>
    %147 = vector.extract_strided_slice %140 {offsets = [0, 96], sizes = [8, 32], strides = [1, 1]} : vector<8x128xf32> to vector<8x32xf32>
    %148 = math.tanh %147 : vector<8x32xf32>
    %149 = vector.extract_strided_slice %146 {offsets = [0, 0], sizes = [8, 32], strides = [1, 1]} : vector<8x96xf32> to vector<8x32xf32>
    %150 = vector.extract_strided_slice %146 {offsets = [0, 32], sizes = [8, 32], strides = [1, 1]} : vector<8x96xf32> to vector<8x32xf32>
    %151 = vector.extract_strided_slice %146 {offsets = [0, 64], sizes = [8, 32], strides = [1, 1]} : vector<8x96xf32> to vector<8x32xf32>
    %152 = arith.mulf %150, %133 : vector<8x32xf32>
    %153 = arith.mulf %149, %148 : vector<8x32xf32>
    %154 = arith.addf %152, %153 : vector<8x32xf32>
    %155 = math.tanh %154 : vector<8x32xf32>
    %156 = arith.mulf %151, %155 : vector<8x32xf32>
    %157 = arith.maximumf %136, %156 : vector<8x32xf32>
    %158 = vector.extract_strided_slice %7 {offsets = [56, 0], sizes = [8, 128], strides = [1, 1]} : vector<64x128xf32> to vector<8x128xf32>
    %c0_34 = arith.constant 0 : index
    %c0_35 = arith.constant 0 : index
    %159 = vector.load %arg2[%c0_34, %c0_35] : memref<32x128xf32, #tpu.memory_space<vmem>>, vector<32x128xf32>
    %cst_36 = arith.constant dense<0.000000e+00> : vector<8x128xf32>
    %160 = tpu.matmul %156, %159, %cst_36 {dimension_numbers = #tpu.dot_dimension_numbers<[1], [0], [0], [1], [0, 0, 1, 1], [], []>} : vector<8x32xf32>, vector<32x128xf32>, vector<8x128xf32> -> vector<8x128xf32>
    %161 = arith.addf %158, %160 : vector<8x128xf32>
    %162 = vector.extract_strided_slice %161 {offsets = [0, 0], sizes = [8, 96], strides = [1, 1]} : vector<8x128xf32> to vector<8x96xf32>
    %163 = arith.negf %162 : vector<8x96xf32>
    %164 = math.exp %163 : vector<8x96xf32>
    %cst_37 = arith.constant 1.000000e+00 : f32
    %165 = vector.broadcast %cst_37 : f32 to vector<8x96xf32>
    %166 = arith.addf %165, %164 : vector<8x96xf32>
    %167 = arith.divf %165, %166 : vector<8x96xf32>
    %168 = vector.extract_strided_slice %161 {offsets = [0, 96], sizes = [8, 32], strides = [1, 1]} : vector<8x128xf32> to vector<8x32xf32>
    %169 = math.tanh %168 : vector<8x32xf32>
    %170 = vector.extract_strided_slice %167 {offsets = [0, 0], sizes = [8, 32], strides = [1, 1]} : vector<8x96xf32> to vector<8x32xf32>
    %171 = vector.extract_strided_slice %167 {offsets = [0, 32], sizes = [8, 32], strides = [1, 1]} : vector<8x96xf32> to vector<8x32xf32>
    %172 = vector.extract_strided_slice %167 {offsets = [0, 64], sizes = [8, 32], strides = [1, 1]} : vector<8x96xf32> to vector<8x32xf32>
    %173 = arith.mulf %171, %154 : vector<8x32xf32>
    %174 = arith.mulf %170, %169 : vector<8x32xf32>
    %175 = arith.addf %173, %174 : vector<8x32xf32>
    %176 = math.tanh %175 : vector<8x32xf32>
    %177 = arith.mulf %172, %176 : vector<8x32xf32>
    %178 = arith.maximumf %157, %177 : vector<8x32xf32>
    %c0_38 = arith.constant 0 : index
    %c0_39 = arith.constant 0 : index
    %179 = vector.load %arg3[%c0_38, %c0_39] : memref<32x128xf32, #tpu.memory_space<vmem>>, vector<32x128xf32>
    %cst_40 = arith.constant dense<0.000000e+00> : vector<8x128xf32>
    %180 = tpu.matmul %178, %179, %cst_40 {dimension_numbers = #tpu.dot_dimension_numbers<[1], [0], [0], [1], [0, 0, 1, 1], [], []>} : vector<8x32xf32>, vector<32x128xf32>, vector<8x128xf32> -> vector<8x128xf32>
    %c0_41 = arith.constant 0 : index
    %c0_42 = arith.constant 0 : index
    %181 = vector.load %arg4[%c0_41, %c0_42] : memref<1x128xf32, #tpu.memory_space<vmem>>, vector<1x128xf32>
    %182 = vector.broadcast %181 : vector<1x128xf32> to vector<8x128xf32>
    %183 = arith.addf %180, %182 : vector<8x128xf32>
    %cst_43 = arith.constant 0.000000e+00 : f32
    %184 = vector.broadcast %cst_43 : f32 to vector<8x128xf32>
    %185 = arith.maximumf %183, %184 : vector<8x128xf32>
    %c0_44 = arith.constant 0 : index
    %c0_45 = arith.constant 0 : index
    %186 = vector.load %arg5[%c0_44, %c0_45] : memref<128x128xf32, #tpu.memory_space<vmem>>, vector<128x128xf32>
    %cst_46 = arith.constant dense<0.000000e+00> : vector<8x128xf32>
    %187 = tpu.matmul %185, %186, %cst_46 {dimension_numbers = #tpu.dot_dimension_numbers<[1], [0], [0], [1], [0, 0, 1, 1], [], []>} : vector<8x128xf32>, vector<128x128xf32>, vector<8x128xf32> -> vector<8x128xf32>
    %c0_47 = arith.constant 0 : index
    %c0_48 = arith.constant 0 : index
    %188 = vector.load %arg6[%c0_47, %c0_48] : memref<1x128xf32, #tpu.memory_space<vmem>>, vector<1x128xf32>
    %189 = vector.broadcast %188 : vector<1x128xf32> to vector<8x128xf32>
    %190 = arith.addf %187, %189 : vector<8x128xf32>
    %c0_49 = arith.constant 0 : index
    %c0_50 = arith.constant 0 : index
    %191 = vector.load %arg7[%c0_49, %c0_50] : memref<8x128xf32, #tpu.memory_space<vmem>>, vector<8x128xf32>
    tpu.vector_store %arg7[%c0_49, %c0_50], %190 {strides = array<i32>} : memref<8x128xf32, #tpu.memory_space<vmem>>, vector<8x128xf32>,
    return
  }
}

</mosaic_0001>

<bundles_post_ra>
// kernel: nnet_forward.1
= control target key start
LH: loop header
LB: loop body
LE: loop exit
PB: predicated region body
PF: predicated region fallthrough
CT: control target
= control target key end

     0   :  { %12 = vsyncpa [#allocation3], 0  ;;  %s1942_s0 = inlined_call_operand.vmem [shape: s32[64,1], index: 0, kind: input, shape index: {}]   ;;  %s1943_s1 = inlined_call_operand.hbm [shape: f32[128,128], index: 1, kind: input, shape index: {}]   ;;  %s1944_s2 = inlined_call_operand.vmem [shape: f32[32,128], index: 2, kind: input, shape index: {}]   ;;  %s1945_s3 = inlined_call_operand.vmem [shape: f32[32,128], index: 3, kind: input, shape index: {}]   ;;  %s1946_s4 = inlined_call_operand.vmem [shape: f32[1,128], index: 4, kind: input, shape index: {}]   ;;  %s1947_s5 = inlined_call_operand.hbm [shape: f32[128,128], index: 5, kind: input, shape index: {}]   ;;  %s1948_s6 = inlined_call_operand.vmem [shape: f32[1,128], index: 6, kind: input, shape index: {}]   ;;  %s1949_s7 = inlined_call_operand.vmem [shape: f32[8,128], index: 7, kind: output, shape index: {}]  }
   0x1   :  { %13 = vsyncpa [#allocation5], 0  ;;  %s1648_s24 = smov [#allocation2]  }
   0x2   :  { %s21_s25 = sshll.u32 %s1648_s24, 4  ;;  %s22_s25 = int_to_ptr.vmem [resolvable:$true] %s21_s25 }
   0x3   :  { %s1612_s26 = scalar_lea.vmem %s22_s25, 2048  ;;  %p1617_p1 = scmp.lt.s32.totalorder %s22_s25, %s22_s25 }
   0x4   :  { %p1613_p0 = scmp.ne.s32.totalorder %s22_s25, %s1612_s26  ;;  %p1618_p2 = scmp.lt.s32.totalorder %s1612_s26, %s1612_s26 }
   0x6   :  { %p1619_p3 = por %p1618_p2, %p1617_p1 }
   0x8   :  { %p1620_p4 = pnand %p1619_p3, %p1613_p0 }
   0xa   :  { %1623 = shalt.err (!%p1620_p4)
}
   0xb   :  { %s1649_s27 = smov 128   ;;  %s1650_s28 = smov 8  }
   0xc   :  { %27 = dma.hbm_to_vmem [thread:$0]  %s1943_s1, 2048, %s22_s25, [#allocation3], %s1649_s27, %s1649_s27, %s1650_s28  }
   0xd   :  { %s1651_s8 = smov [#allocation4]  }
   0xe   :  { %s39_s9 = sshll.u32 %s1651_s8, 4  ;;  %s40_s9 = int_to_ptr.vmem [resolvable:$true] %s39_s9 }
   0xf   :  { %s1632_s10 = scalar_lea.vmem %s40_s9, 2048  ;;  %p1637_p6 = scmp.lt.s32.totalorder %s40_s9, %s40_s9 }
  0x10   :  { %p1633_p5 = scmp.ne.s32.totalorder %s40_s9, %s1632_s10  ;;  %p1638_p7 = scmp.lt.s32.totalorder %s1632_s10, %s1632_s10 }
  0x12   :  { %p1639_p8 = por %p1638_p7, %p1637_p6 }
  0x14   :  { %p1640_p9 = pnand %p1639_p8, %p1633_p5 }
  0x16   :  { %1643 = shalt.err (!%p1640_p9)
}
  0x17   :  { %45 = dma.hbm_to_vmem [thread:$0]  %s1947_s5, 2048, %s40_s9, [#allocation5], %s1649_s27, %s1649_s27, %s1650_s28  }
  0x18   :  { %1644 = dma.done.wait [#allocation3], 2048  }
  0x19   :  { %1645 = vsyncadd [#allocation3], 4294965248 }
  0x1a   :  { %1646 = dma.done.wait [#allocation5], 2048  }
  0x1b   :  { %1647 = vsyncadd [#allocation5], 4294965248  ;;  %v1652_v0 = vmov 0   ;;  %v1653_v1 = vmov 0.0   ;;  %v56_v2 = vld [vmem:[%s1942_s0] sm:$0xff]  ;;  %v127_v3 = vld [vmem:[#allocation2 + $0x78] sm:$0xff]  ;;  %v54_v24 = vlaneseq }
  0x1c   :  { %1538 = vset.pattern.permute.xlu0 %v1652_v0  ;;  %1394 = vmatprep.subr.mxu1 %v1653_v1  ;;  %v126_v4 = vld [vmem:[#allocation2 + $0x70] sm:$0xff]  ;;  %v57_v5 = vld [vmem:[%s1942_s0 + $0x8] sm:$0xff]  ;;  %vm1654_vm0 = vmmov 0   ;;  %v124_v7 = vld [vmem:[#allocation2 + $0x60] sm:$0xff]  ;;  %v1655_v27 = vmov 1.0   ;;  %s1657_s23 = smov 64  }
  0x1d   :  { %1539 = vset.pattern.permute.xlu1 %v1652_v0  ;;  %65 = vperm.xlu0 %1538, %v56_v2   ;;  %v125_v6 = vld [vmem:[#allocation2 + $0x68] sm:$0xff]  ;;  %v1716_v8 = vld [vmem:[%s1944_s2 + $0x18] sm:$0xff]  ;;  %v1721_v9 = vld [vmem:[%s1944_s2 + $0x10] sm:$0xff]  ;;  %v1753_v25 = vand.u32 127, %v54_v24  ;;  %vm237_vm3 = vcmask 261120  }
  0x1e   :  { %1350 = vmatprep.subr.mxu0 %v127_v3  ;;  %1402 = vmatprep.mubr.msk.f32.mxu1 %vm1654_vm0, %v1653_v1  ;;  %v123_v10 = vld [vmem:[#allocation2 + $0x58] sm:$0xff]  ;;  %v1728_v11 = vld [vmem:[%s1944_s2 + $0x8] sm:$0xff]  ;;  %v122_v12 = vld [vmem:[#allocation2 + $0x50] sm:$0xff] }
  0x1f   :  { %1351 = vmatpush3.msra.mxu0 %v127_v3  ;;  %1395 = vmatpush3.msra.mxu1 %v1716_v8  ;;  %v1735_v13 = vld [vmem:[%s1944_s2] sm:$0xff]  ;;  %v121_v14 = vld [vmem:[#allocation2 + $0x48] sm:$0xff]  ;;  %v119_v16 = vld [vmem:[#allocation2 + $0x38] sm:$0xff]  ;;  %s1656_s2 = smov 32  }
  0x20   :  { %1352 = vmatprep.subr.mxu0 %v126_v4  ;;  %1396 = vmatprep.subr.mxu1 %v1653_v1  ;;  %v120_v15 = vld [vmem:[#allocation2 + $0x40] sm:$0xff]  ;;  %v118_v17 = vld [vmem:[#allocation2 + $0x30] sm:$0xff]  ;;  %v117_v18 = vld [vmem:[#allocation2 + $0x28] sm:$0xff] }
  0x21   :  { %1353 = vmatpush3.msra.mxu0 %v126_v4  ;;  %68 = vperm.xlu0 %1538, %v57_v5   ;;  %v116_v19 = vld [vmem:[#allocation2 + $0x20] sm:$0xff]  ;;  %v115_v20 = vld [vmem:[#allocation2 + $0x18] sm:$0xff]  ;;  %v114_v21 = vld [vmem:[#allocation2 + $0x10] sm:$0xff] }
  0x22   :  { %1354 = vmatprep.subr.mxu0 %v125_v6  ;;  %1397 = vmatpush3.msra.mxu1 %v1721_v9  ;;  %v113_v22 = vld [vmem:[#allocation2 + $0x8] sm:$0xff]  ;;  %v112_v23 = vld [vmem:[#allocation2] sm:$0xff]  ;;  %v58_v58 = vld [vmem:[%s1942_s0 + $0x10] sm:$0xff] }
  0x23   :  { %1355 = vmatpush3.msra.mxu0 %v125_v6  ;;  %1398 = vmatprep.subr.mxu1 %v1653_v1  ;;  %v59_v0 = vld [vmem:[%s1942_s0 + $0x18] sm:$0xff] }
  0x24   :  { %1356 = vmatprep.subr.mxu0 %v124_v7  ;;  %1399 = vmatpush3.msra.mxu1 %v1728_v11 }
  0x25   :  { %1357 = vmatpush3.msra.mxu0 %v124_v7  ;;  %1400 = vmatprep.subr.mxu1 %v1653_v1 }
  0x26   :  { %1358 = vmatprep.subr.mxu0 %v123_v10  ;;  %1401 = vmatpush3.msra.mxu1 %v1735_v13 }
  0x27   :  { %1359 = vmatpush3.msra.mxu0 %v123_v10  ;;  %1403 = vmatmul.mubr.f32.vlgmr.msra.gmra.mxu1 %v1653_v1 }
  0x28   :  { %1360 = vmatprep.subr.mxu0 %v122_v12  ;;  %1405 = vmatprep.subr.mxu1 %v1653_v1 }
  0x29   :  { %1361 = vmatpush3.msra.mxu0 %v122_v12  ;;  %1406 = vmatpush3.msra.mxu1 %v1716_v8 }
  0x2a   :  { %1362 = vmatprep.subr.mxu0 %v121_v14  ;;  %1407 = vmatprep.subr.mxu1 %v1653_v1 }
  0x2b   :  { %1363 = vmatpush3.msra.mxu0 %v121_v14  ;;  %1408 = vmatpush3.msra.mxu1 %v1721_v9 }
  0x2c   :  { %1364 = vmatprep.subr.mxu0 %v120_v15  ;;  %1409 = vmatprep.subr.mxu1 %v1653_v1 }
  0x2d   :  { %1365 = vmatpush3.msra.mxu0 %v120_v15  ;;  %1410 = vmatpush3.msra.mxu1 %v1728_v11 }
  0x2e   :  { %1366 = vmatprep.subr.mxu0 %v119_v16  ;;  %1411 = vmatprep.subr.mxu1 %v1653_v1 }
  0x2f   :  { %1367 = vmatpush3.msra.mxu0 %v119_v16  ;;  %1412 = vmatpush3.msra.mxu1 %v1735_v13 }
  0x30   :  { %1368 = vmatprep.subr.mxu0 %v118_v17  ;;  %1413 = vmatprep.mubr.msk.f32.mxu1 %vm1654_vm0, %v1653_v1 }
  0x31   :  { %1369 = vmatpush3.msra.mxu0 %v118_v17  ;;  %1416 = vmatprep.subr.mxu1 %v1653_v1 }
  0x32   :  { %1370 = vmatprep.subr.mxu0 %v117_v18 }
  0x33   :  { %1371 = vmatpush3.msra.mxu0 %v117_v18 }
  0x34   :  { %1372 = vmatprep.subr.mxu0 %v116_v19 }
  0x35   :  { %1373 = vmatpush3.msra.mxu0 %v116_v19 }
  0x36   :  { %1374 = vmatprep.subr.mxu0 %v115_v20 }
  0x37   :  { %1375 = vmatpush3.msra.mxu0 %v115_v20 }
  0x38   :  { %1376 = vmatprep.subr.mxu0 %v114_v21 }
  0x39   :  { %1377 = vmatpush3.msra.mxu0 %v114_v21 }
  0x3a   :  { %1378 = vmatprep.subr.mxu0 %v113_v22 }
  0x3b   :  { %1379 = vmatpush3.msra.mxu0 %v113_v22 }
  0x3c   :  { %1380 = vmatprep.subr.mxu0 %v112_v23 }
  0x3d   :  { %1381 = vmatpush3.msra.mxu0 %v112_v23 }
  0x3e   :  { %1493 = vmatprep.subr.mxu0 %v1653_v1 }
  0x98   :  { %v66_v26 = vpop.permute.xlu0 %65 }
  0x99   :  { %vm88_vm1 = vcmp.eq.s32.totalorder %v1753_v25, %v66_v26 }
  0x9a   :  { %1382 = vmatprep.mubr.msk.f32.mxu0 %vm88_vm1, %v1655_v27 }
  0x9c   :  { %v69_v28 = vpop.permute.xlu0 %68 }
  0x9d   :  { %vm89_vm2 = vcmp.eq.s32.totalorder %v1753_v25, %v69_v28 }
  0x9e   :  { %1383 = vmatmul.mubr.msk.f32.vlgmr.msra.gmra.mxu0 %vm89_vm2, %v1655_v27 }
  0xe7   :  { %v307_v29 = vpop.f32.mrf.mxu1 }
  0xe9   :  { %v1404_v30 = vpop.f32.mrf.mxu1 }
 0x15e   :  { %v1384_v31 = vpop.f32.mrf.mxu0 }
 0x160   :  { %v194_v32 = vpop.f32.mrf.mxu0 }
 0x161   :  { %v311_v33 = vadd.f32 %v307_v29, %v194_v32 }
 0x163   :  { %1540 = vtanh.f32 %v311_v33  ;;  %v1246_v35 = vmul.f32 -1.442695, %v311_v33 }
 0x165   :  { %1542 = vpow2.f32 %v1246_v35 }
 0x170   :  { %v1541_v34 = vpop.eup %1540 }
 0x171   :  { %321 = vrot.lane.b32.xlu1 %v1541_v34, %s1656_s2 }
 0x172   :  { %v1543_v36 = vpop.eup %1542 }
 0x173   :  { %v315_v37 = vadd.f32 1.0, %v1543_v36 }
 0x175   :  { %1544 = vrcp.f32 %v315_v37 }
 0x182   :  { %v1545_v38 = vpop.eup %1544 }
 0x183   :  { %v319_v41 = vmul.f32 0.0, %v1545_v38 }
 0x1e3   :  { %v322_v39 = vpop.permute.xlu1 %321 }
 0x1e4   :  { %v324_v40 = vmul.f32 %v1545_v38, %v322_v39 }
 0x1e6   :  { %326 = vrot.lane.b32.xlu1 %v324_v40, %s1656_s2 }
 0x258   :  { %v327_v42 = vpop.permute.xlu1 %326 }
 0x259   :  { %v329_v43 = vadd.f32 %v327_v42, %v319_v41 }
 0x25b   :  { %1546 = vtanh.f32 %v329_v43 }
 0x268   :  { %v1547_v44 = vpop.eup %1546 }
 0x269   :  { %332 = vrot.lane.b32.xlu0 %v1547_v44, %s1656_s2 }
 0x2db   :  { %v333_v45 = vpop.permute.xlu0 %332 }
 0x2dc   :  { %v1762_v46 = vmul.f32 %v1545_v38, %v333_v45 }
 0x2de   :  { %337 = vrot.lane.b32.xlu1 %v1762_v46, %s1657_s23 }
 0x350   :  { %v338_v47 = vpop.permute.xlu1 %337 }
 0x351   :  { %1414 = vmatmul.mubr.msk.f32.vlgmr.msra.gmra.mxu1 %vm237_vm3, %v338_v47 }
 0x352   :  { %1417 = vmatpush3.msra.mxu1 %v1716_v8  ;;  %1424 = vmatprep.mubr.msk.f32.mxu1 %vm1654_vm0, %v1653_v1 }
 0x353   :  { %1418 = vmatprep.subr.mxu1 %v1653_v1 }
 0x354   :  { %1419 = vmatpush3.msra.mxu1 %v1721_v9 }
 0x355   :  { %1420 = vmatprep.subr.mxu1 %v1653_v1 }
 0x356   :  { %1421 = vmatpush3.msra.mxu1 %v1728_v11 }
 0x357   :  { %1422 = vmatprep.subr.mxu1 %v1653_v1 }
 0x358   :  { %1423 = vmatpush3.msra.mxu1 %v1735_v13 }
 0x359   :  { %1427 = vmatprep.subr.mxu1 %v1653_v1 }
 0x411   :  { %v407_v48 = vpop.f32.mrf.mxu1 }
 0x412   :  { %v411_v49 = vadd.f32 %v1384_v31, %v407_v48 }
 0x413   :  { %v1415_v50 = vpop.f32.mrf.mxu1 }
 0x414   :  { %1548 = vtanh.f32 %v411_v49  ;;  %v1248_v52 = vmul.f32 -1.442695, %v411_v49  ;;  %v61_v49 = vld [vmem:[%s1942_s0 + $0x28] sm:$0xff] }
 0x416   :  { %1550 = vpow2.f32 %v1248_v52 }
 0x421   :  { %v1549_v51 = vpop.eup %1548 }
 0x422   :  { %421 = vrot.lane.b32.xlu0 %v1549_v51, %s1656_s2 }
 0x423   :  { %v1551_v53 = vpop.eup %1550 }
 0x424   :  { %v415_v54 = vadd.f32 1.0, %v1551_v53 }
 0x426   :  { %1552 = vrcp.f32 %v415_v54 }
 0x433   :  { %v1553_v55 = vpop.eup %1552 }
 0x434   :  { %v419_v59 = vmul.f32 %v1553_v55, %v329_v43  ;;  %v60_v43 = vld [vmem:[%s1942_s0 + $0x20] sm:$0xff] }
 0x494   :  { %v422_v56 = vpop.permute.xlu0 %421 }
 0x495   :  { %v424_v57 = vmul.f32 %v1553_v55, %v422_v56 }
 0x497   :  { %426 = vrot.lane.b32.xlu1 %v424_v57, %s1656_s2 }
 0x49b   :  { %71 = vperm.xlu1 %1539, %v58_v58  }
 0x509   :  { %v427_v60 = vpop.permute.xlu1 %426 }
 0x50a   :  { %v429_v61 = vadd.f32 %v427_v60, %v419_v59 }
 0x50c   :  { %1554 = vtanh.f32 %v429_v61 }
 0x516   :  { %v72_v62 = vpop.permute.xlu1 %71 }
 0x517   :  { %vm90_vm4 = vcmp.eq.s32.totalorder %v1753_v25, %v72_v62 }
 0x518   :  { %1385 = vmatprep.mubr.msk.f32.mxu0 %vm90_vm4, %v1655_v27 }
 0x519   :  { %v1555_v63 = vpop.eup %1554 }
 0x51a   :  { %432 = vrot.lane.b32.xlu0 %v1555_v63, %s1656_s2 }
 0x51e   :  { %74 = vperm.xlu0 %1538, %v59_v0  }
 0x58c   :  { %v433_v2 = vpop.permute.xlu0 %432 }
 0x58d   :  { %v435_v3 = vmul.f32 %v1553_v55, %v433_v2 }
 0x58f   :  { %438 = vrot.lane.b32.xlu1 %v435_v3, %s1657_s23  ;;  %v436_v29 = vmax.f32 %v1762_v46, %v435_v3 }
 0x599   :  { %v75_v4 = vpop.permute.xlu0 %74 }
 0x59a   :  { %vm91_vm5 = vcmp.eq.s32.totalorder %v1753_v25, %v75_v4 }
 0x59b   :  { %1386 = vmatmul.mubr.msk.f32.gmra.mxu0 %vm91_vm5, %v1655_v27 }
 0x601   :  { %v439_v5 = vpop.permute.xlu1 %438 }
 0x602   :  { %1425 = vmatmul.mubr.msk.f32.vlgmr.msra.gmra.mxu1 %vm237_vm3, %v439_v5 }
 0x603   :  { %1428 = vmatpush3.msra.mxu1 %v1716_v8  ;;  %1435 = vmatprep.mubr.msk.f32.mxu1 %vm1654_vm0, %v1653_v1 }
 0x604   :  { %1429 = vmatprep.subr.mxu1 %v1653_v1 }
 0x605   :  { %1430 = vmatpush3.msra.mxu1 %v1721_v9 }
 0x606   :  { %1431 = vmatprep.subr.mxu1 %v1653_v1 }
 0x607   :  { %1432 = vmatpush3.msra.mxu1 %v1728_v11 }
 0x608   :  { %1433 = vmatprep.subr.mxu1 %v1653_v1 }
 0x609   :  { %1434 = vmatpush3.msra.mxu1 %v1735_v13 }
 0x60a   :  { %1438 = vmatprep.subr.mxu1 %v1653_v1 }
 0x65b   :  { %v1387_v6 = vpop.f32.mrf.mxu0 }
 0x65d   :  { %v204_v7 = vpop.f32.mrf.mxu0 }
 0x6c2   :  { %v508_v10 = vpop.f32.mrf.mxu1 }
 0x6c3   :  { %v512_v12 = vadd.f32 %v508_v10, %v204_v7 }
 0x6c4   :  { %v1426_v14 = vpop.f32.mrf.mxu1 }
 0x6c5   :  { %1556 = vtanh.f32 %v512_v12  ;;  %v1250_v16 = vmul.f32 -1.442695, %v512_v12 }
 0x6c7   :  { %1558 = vpow2.f32 %v1250_v16 }
 0x6d2   :  { %v1557_v15 = vpop.eup %1556 }
 0x6d3   :  { %522 = vrot.lane.b32.xlu0 %v1557_v15, %s1656_s2 }
 0x6d4   :  { %v1559_v17 = vpop.eup %1558 }
 0x6d5   :  { %v516_v18 = vadd.f32 1.0, %v1559_v17 }
 0x6d7   :  { %1560 = vrcp.f32 %v516_v18 }
 0x6e4   :  { %v1561_v19 = vpop.eup %1560 }
 0x6e5   :  { %v520_v22 = vmul.f32 %v1561_v19, %v429_v61 }
 0x745   :  { %v523_v20 = vpop.permute.xlu0 %522 }
 0x746   :  { %v525_v21 = vmul.f32 %v1561_v19, %v523_v20 }
 0x748   :  { %527 = vrot.lane.b32.xlu1 %v525_v21, %s1656_s2 }
 0x7ba   :  { %v528_v23 = vpop.permute.xlu1 %527 }
 0x7bb   :  { %v530_v24 = vadd.f32 %v528_v23, %v520_v22 }
 0x7bd   :  { %1562 = vtanh.f32 %v530_v24 }
 0x7ca   :  { %v1563_v26 = vpop.eup %1562 }
 0x7cb   :  { %533 = vrot.lane.b32.xlu0 %v1563_v26, %s1656_s2 }
 0x83d   :  { %v534_v28 = vpop.permute.xlu0 %533 }
 0x83e   :  { %v536_v30 = vmul.f32 %v1561_v19, %v534_v28  ;;  %v62_v28 = vld [vmem:[%s1942_s0 + $0x30] sm:$0xff] }
 0x840   :  { %v1806_v31 = vmax.f32 %v436_v29, %v536_v30  ;;  %539 = vrot.lane.b32.xlu1 %v536_v30, %s1657_s23 }
 0x8b2   :  { %v540_v32 = vpop.permute.xlu1 %539 }
 0x8b3   :  { %1436 = vmatmul.mubr.msk.f32.vlgmr.msra.gmra.mxu1 %vm237_vm3, %v540_v32 }
 0x8b4   :  { %1439 = vmatpush3.msra.mxu1 %v1716_v8  ;;  %1446 = vmatprep.mubr.msk.f32.mxu1 %vm1654_vm0, %v1653_v1 }
 0x8b5   :  { %1440 = vmatprep.subr.mxu1 %v1653_v1 }
 0x8b6   :  { %1441 = vmatpush3.msra.mxu1 %v1721_v9 }
 0x8b7   :  { %1442 = vmatprep.subr.mxu1 %v1653_v1 }
 0x8b8   :  { %1443 = vmatpush3.msra.mxu1 %v1728_v11 }
 0x8b9   :  { %1444 = vmatprep.subr.mxu1 %v1653_v1 }
 0x8ba   :  { %1445 = vmatpush3.msra.mxu1 %v1735_v13 }
 0x8bb   :  { %1449 = vmatprep.subr.mxu1 %v1653_v1 }
 0x973   :  { %v609_v33 = vpop.f32.mrf.mxu1 }
 0x974   :  { %v613_v34 = vadd.f32 %v1387_v6, %v609_v33 }
 0x975   :  { %v1437_v35 = vpop.f32.mrf.mxu1 }
 0x976   :  { %1564 = vtanh.f32 %v613_v34  ;;  %v1252_v37 = vmul.f32 -1.442695, %v613_v34  ;;  %v63_v34 = vld [vmem:[%s1942_s0 + $0x38] sm:$0xff] }
 0x978   :  { %1566 = vpow2.f32 %v1252_v37 }
 0x983   :  { %v1565_v36 = vpop.eup %1564 }
 0x984   :  { %623 = vrot.lane.b32.xlu0 %v1565_v36, %s1656_s2 }
 0x985   :  { %v1567_v38 = vpop.eup %1566 }
 0x986   :  { %v617_v39 = vadd.f32 1.0, %v1567_v38 }
 0x988   :  { %1568 = vrcp.f32 %v617_v39 }
 0x995   :  { %v1569_v40 = vpop.eup %1568 }
 0x996   :  { %v621_v44 = vmul.f32 %v1569_v40, %v530_v24 }
 0x9f6   :  { %v624_v41 = vpop.permute.xlu0 %623 }
 0x9f7   :  { %v626_v42 = vmul.f32 %v1569_v40, %v624_v41 }
 0x9f9   :  { %628 = vrot.lane.b32.xlu1 %v626_v42, %s1656_s2 }
 0x9fd   :  { %77 = vperm.xlu1 %1539, %v60_v43  }
 0xa6b   :  { %v629_v45 = vpop.permute.xlu1 %628 }
 0xa6c   :  { %v631_v46 = vadd.f32 %v629_v45, %v621_v44 }
 0xa6e   :  { %1570 = vtanh.f32 %v631_v46 }
 0xa78   :  { %v78_v47 = vpop.permute.xlu1 %77 }
 0xa79   :  { %vm92_vm6 = vcmp.eq.s32.totalorder %v1753_v25, %v78_v47 }
 0xa7a   :  { %1388 = vmatprep.mubr.msk.f32.mxu0 %vm92_vm6, %v1655_v27 }
 0xa7b   :  { %v1571_v48 = vpop.eup %1570 }
 0xa7c   :  { %634 = vrot.lane.b32.xlu0 %v1571_v48, %s1656_s2 }
 0xa80   :  { %80 = vperm.xlu0 %1538, %v61_v49  }
 0xaee   :  { %v635_v50 = vpop.permute.xlu0 %634 }
 0xaef   :  { %v637_v51 = vmul.f32 %v1569_v40, %v635_v50 }
 0xaf1   :  { %v638_v52 = vmax.f32 %v1806_v31, %v637_v51  ;;  %640 = vrot.lane.b32.xlu1 %v637_v51, %s1657_s23 }
 0xafb   :  { %v81_v53 = vpop.permute.xlu0 %80 }
 0xafc   :  { %vm93_vm7 = vcmp.eq.s32.totalorder %v1753_v25, %v81_v53 }
 0xafd   :  { %1389 = vmatmul.mubr.msk.f32.gmra.mxu0 %vm93_vm7, %v1655_v27 }
 0xb63   :  { %v641_v54 = vpop.permute.xlu1 %640 }
 0xb64   :  { %1447 = vmatmul.mubr.msk.f32.vlgmr.msra.gmra.mxu1 %vm237_vm3, %v641_v54 }
 0xb65   :  { %1450 = vmatpush3.msra.mxu1 %v1716_v8  ;;  %1457 = vmatprep.mubr.msk.f32.mxu1 %vm1654_vm0, %v1653_v1 }
 0xb66   :  { %1451 = vmatprep.subr.mxu1 %v1653_v1 }
 0xb67   :  { %1452 = vmatpush3.msra.mxu1 %v1721_v9 }
 0xb68   :  { %1453 = vmatprep.subr.mxu1 %v1653_v1 }
 0xb69   :  { %1454 = vmatpush3.msra.mxu1 %v1728_v11 }
 0xb6a   :  { %1455 = vmatprep.subr.mxu1 %v1653_v1 }
 0xb6b   :  { %1456 = vmatpush3.msra.mxu1 %v1735_v13 }
 0xb6c   :  { %1460 = vmatprep.subr.mxu1 %v1653_v1 }
 0xbbd   :  { %v1390_v55 = vpop.f32.mrf.mxu0 }
 0xbbf   :  { %v214_v56 = vpop.f32.mrf.mxu0 }
 0xc24   :  { %v710_v57 = vpop.f32.mrf.mxu1 }
 0xc25   :  { %v714_v58 = vadd.f32 %v710_v57, %v214_v56 }
 0xc26   :  { %v1448_v59 = vpop.f32.mrf.mxu1 }
 0xc27   :  { %1572 = vtanh.f32 %v714_v58  ;;  %v1254_v61 = vmul.f32 -1.442695, %v714_v58 }
 0xc29   :  { %1574 = vpow2.f32 %v1254_v61 }
 0xc34   :  { %v1573_v60 = vpop.eup %1572 }
 0xc35   :  { %724 = vrot.lane.b32.xlu0 %v1573_v60, %s1656_s2 }
 0xc36   :  { %v1575_v62 = vpop.eup %1574 }
 0xc37   :  { %v718_v63 = vadd.f32 1.0, %v1575_v62 }
 0xc39   :  { %1576 = vrcp.f32 %v718_v63 }
 0xc46   :  { %v1577_v0 = vpop.eup %1576 }
 0xc47   :  { %v722_v4 = vmul.f32 %v1577_v0, %v631_v46 }
 0xca7   :  { %v725_v2 = vpop.permute.xlu0 %724 }
 0xca8   :  { %v727_v3 = vmul.f32 %v1577_v0, %v725_v2 }
 0xcaa   :  { %729 = vrot.lane.b32.xlu1 %v727_v3, %s1656_s2 }
 0xd1c   :  { %v730_v5 = vpop.permute.xlu1 %729 }
 0xd1d   :  { %v732_v6 = vadd.f32 %v730_v5, %v722_v4  ;;  %v1046_v4 = vld [vmem:[%s1945_s3 + $0x18] sm:$0xff]  ;;  %v1045_v5 = vld [vmem:[%s1945_s3 + $0x10] sm:$0xff] }
 0xd1f   :  { %1578 = vtanh.f32 %v732_v6 }
 0xd2c   :  { %v1579_v7 = vpop.eup %1578 }
 0xd2d   :  { %735 = vrot.lane.b32.xlu0 %v1579_v7, %s1656_s2  ;;  %v1043_v7 = vld [vmem:[%s1945_s3] sm:$0xff] }
 0xd9f   :  { %v736_v10 = vpop.permute.xlu0 %735 }
 0xda0   :  { %v738_v12 = vmul.f32 %v1577_v0, %v736_v10 }
 0xda2   :  { %v1849_v14 = vmax.f32 %v638_v52, %v738_v12  ;;  %741 = vrot.lane.b32.xlu1 %v738_v12, %s1657_s23  ;;  %v1145_v12 = vld [vmem:[#allocation4 + $0x78] sm:$0xff] }
 0xda3   :  { %1494 = vmatpush3.msra.mxu0 %v1145_v12 }
 0xda4   :  { %1495 = vmatprep.subr.mxu0 %v1653_v1 }
 0xe14   :  { %v742_v15 = vpop.permute.xlu1 %741 }
 0xe15   :  { %1458 = vmatmul.mubr.msk.f32.vlgmr.msra.gmra.mxu1 %vm237_vm3, %v742_v15  ;;  %v1143_v15 = vld [vmem:[#allocation4 + $0x68] sm:$0xff] }
 0xe16   :  { %1461 = vmatpush3.msra.mxu1 %v1716_v8  ;;  %1468 = vmatprep.mubr.msk.f32.mxu1 %vm1654_vm0, %v1653_v1 }
 0xe17   :  { %1462 = vmatprep.subr.mxu1 %v1653_v1 }
 0xe18   :  { %1463 = vmatpush3.msra.mxu1 %v1721_v9 }
 0xe19   :  { %1464 = vmatprep.subr.mxu1 %v1653_v1 }
 0xe1a   :  { %1465 = vmatpush3.msra.mxu1 %v1728_v11 }
 0xe1b   :  { %1466 = vmatprep.subr.mxu1 %v1653_v1 }
 0xe1c   :  { %1467 = vmatpush3.msra.mxu1 %v1735_v13 }
 0xe1d   :  { %1471 = vmatprep.subr.mxu1 %v1653_v1 }
 0xed5   :  { %v811_v16 = vpop.f32.mrf.mxu1 }
 0xed6   :  { %v815_v17 = vadd.f32 %v1390_v55, %v811_v16  ;;  %v1142_v16 = vld [vmem:[#allocation4 + $0x60] sm:$0xff] }
 0xed7   :  { %v1459_v18 = vpop.f32.mrf.mxu1 }
 0xed8   :  { %1580 = vtanh.f32 %v815_v17  ;;  %v1256_v20 = vmul.f32 -1.442695, %v815_v17  ;;  %v1141_v17 = vld [vmem:[#allocation4 + $0x58] sm:$0xff] }
 0xeda   :  { %1582 = vpow2.f32 %v1256_v20 }
 0xee5   :  { %v1581_v19 = vpop.eup %1580 }
 0xee6   :  { %825 = vrot.lane.b32.xlu0 %v1581_v19, %s1656_s2  ;;  %v1140_v19 = vld [vmem:[#allocation4 + $0x50] sm:$0xff] }
 0xee7   :  { %v1583_v21 = vpop.eup %1582 }
 0xee8   :  { %v819_v22 = vadd.f32 1.0, %v1583_v21  ;;  %v1139_v21 = vld [vmem:[#allocation4 + $0x48] sm:$0xff] }
 0xeea   :  { %1584 = vrcp.f32 %v819_v22 }
 0xef7   :  { %v1585_v23 = vpop.eup %1584 }
 0xef8   :  { %v823_v29 = vmul.f32 %v1585_v23, %v732_v6  ;;  %v1044_v6 = vld [vmem:[%s1945_s3 + $0x8] sm:$0xff] }
 0xf58   :  { %v826_v24 = vpop.permute.xlu0 %825 }
 0xf59   :  { %v828_v26 = vmul.f32 %v1585_v23, %v826_v24  ;;  %v1137_v24 = vld [vmem:[#allocation4 + $0x38] sm:$0xff] }
 0xf5b   :  { %830 = vrot.lane.b32.xlu1 %v828_v26, %s1656_s2  ;;  %v1136_v26 = vld [vmem:[#allocation4 + $0x30] sm:$0xff] }
 0xf5f   :  { %83 = vperm.xlu1 %1539, %v62_v28   ;;  %v1135_v28 = vld [vmem:[#allocation4 + $0x28] sm:$0xff] }
 0xfcd   :  { %v831_v30 = vpop.permute.xlu1 %830 }
 0xfce   :  { %v833_v31 = vadd.f32 %v831_v30, %v823_v29  ;;  %v1134_v29 = vld [vmem:[#allocation4 + $0x20] sm:$0xff]  ;;  %v1133_v30 = vld [vmem:[#allocation4 + $0x18] sm:$0xff] }
 0xfd0   :  { %1586 = vtanh.f32 %v833_v31 }
 0xfda   :  { %v84_v32 = vpop.permute.xlu1 %83 }
 0xfdb   :  { %vm94_vm8 = vcmp.eq.s32.totalorder %v1753_v25, %v84_v32  ;;  %v1132_v32 = vld [vmem:[#allocation4 + $0x10] sm:$0xff] }
 0xfdc   :  { %1391 = vmatprep.mubr.msk.f32.mxu0 %vm94_vm8, %v1655_v27 }
 0xfdd   :  { %v1587_v33 = vpop.eup %1586 }
 0xfde   :  { %836 = vrot.lane.b32.xlu0 %v1587_v33, %s1656_s2  ;;  %v1131_v33 = vld [vmem:[#allocation4 + $0x8] sm:$0xff] }
 0xfe2   :  { %86 = vperm.xlu0 %1538, %v63_v34   ;;  %v1130_v34 = vld [vmem:[#allocation4] sm:$0xff] }
0x1050   :  { %v837_v35 = vpop.permute.xlu0 %836 }
0x1051   :  { %v839_v36 = vmul.f32 %v1585_v23, %v837_v35  ;;  %v1138_v23 = vld [vmem:[#allocation4 + $0x40] sm:$0xff] }
0x1052   :  { %v1261_v35 = vld [vmem:[%s1946_s4] ss:$0 sm:$0xff] }
0x1053   :  { %v840_v37 = vmax.f32 %v1849_v14, %v839_v36  ;;  %842 = vrot.lane.b32.xlu1 %v839_v36, %s1657_s23  ;;  %v1144_v14 = vld [vmem:[#allocation4 + $0x70] sm:$0xff] }
0x1054   :  { %1496 = vmatpush3.msra.mxu0 %v1144_v14 }
0x1055   :  { %1497 = vmatprep.subr.mxu0 %v1653_v1 }
0x1056   :  { %1498 = vmatpush3.msra.mxu0 %v1143_v15 }
0x1057   :  { %1499 = vmatprep.subr.mxu0 %v1653_v1 }
0x1058   :  { %1500 = vmatpush3.msra.mxu0 %v1142_v16 }
0x1059   :  { %1501 = vmatprep.subr.mxu0 %v1653_v1 }
0x105a   :  { %1502 = vmatpush3.msra.mxu0 %v1141_v17 }
0x105b   :  { %1503 = vmatprep.subr.mxu0 %v1653_v1 }
0x105c   :  { %1504 = vmatpush3.msra.mxu0 %v1140_v19 }
0x105d   :  { %v87_v38 = vpop.permute.xlu0 %86  ;;  %1505 = vmatprep.subr.mxu0 %v1653_v1 }
0x105e   :  { %vm95_vm9 = vcmp.eq.s32.totalorder %v1753_v25, %v87_v38  ;;  %1506 = vmatpush3.msra.mxu0 %v1139_v21 }
0x105f   :  { %1392 = vmatmul.mubr.msk.f32.gmra.mxu0 %vm95_vm9, %v1655_v27  ;;  %1507 = vmatprep.subr.mxu0 %v1653_v1 }
0x1060   :  { %1525 = vmatprep.mubr.msk.f32.mxu0 %vm1654_vm0, %v1653_v1  ;;  %1508 = vmatpush3.msra.mxu0 %v1138_v23 }
0x1061   :  { %1509 = vmatprep.subr.mxu0 %v1653_v1 }
0x1062   :  { %1510 = vmatpush3.msra.mxu0 %v1137_v24 }
0x1063   :  { %1511 = vmatprep.subr.mxu0 %v1653_v1 }
0x1064   :  { %1512 = vmatpush3.msra.mxu0 %v1136_v26 }
0x1065   :  { %1513 = vmatprep.subr.mxu0 %v1653_v1 }
0x1066   :  { %1514 = vmatpush3.msra.mxu0 %v1135_v28 }
0x1067   :  { %1515 = vmatprep.subr.mxu0 %v1653_v1 }
0x1068   :  { %1516 = vmatpush3.msra.mxu0 %v1134_v29 }
0x1069   :  { %1517 = vmatprep.subr.mxu0 %v1653_v1 }
0x106a   :  { %1518 = vmatpush3.msra.mxu0 %v1133_v30 }
0x106b   :  { %1519 = vmatprep.subr.mxu0 %v1653_v1 }
0x106c   :  { %1520 = vmatpush3.msra.mxu0 %v1132_v32 }
0x106d   :  { %1521 = vmatprep.subr.mxu0 %v1653_v1 }
0x106e   :  { %1522 = vmatpush3.msra.mxu0 %v1131_v33 }
0x106f   :  { %1523 = vmatprep.subr.mxu0 %v1653_v1 }
0x1070   :  { %1524 = vmatpush3.msra.mxu0 %v1130_v34 }
0x10c5   :  { %v843_v39 = vpop.permute.xlu1 %842 }
0x10c6   :  { %1469 = vmatmul.mubr.msk.f32.vlgmr.msra.gmra.mxu1 %vm237_vm3, %v843_v39 }
0x10c7   :  { %1472 = vmatpush3.msra.mxu1 %v1716_v8  ;;  %1479 = vmatprep.mubr.msk.f32.mxu1 %vm1654_vm0, %v1653_v1 }
0x10c8   :  { %1473 = vmatprep.subr.mxu1 %v1653_v1 }
0x10c9   :  { %1474 = vmatpush3.msra.mxu1 %v1721_v9 }
0x10ca   :  { %1475 = vmatprep.subr.mxu1 %v1653_v1 }
0x10cb   :  { %1476 = vmatpush3.msra.mxu1 %v1728_v11 }
0x10cc   :  { %1477 = vmatprep.subr.mxu1 %v1653_v1 }
0x10cd   :  { %1478 = vmatpush3.msra.mxu1 %v1735_v13 }
0x10ce   :  { %1482 = vmatprep.subr.mxu1 %v1653_v1 }
0x111f   :  { %v1393_v25 = vpop.f32.mrf.mxu0 }
0x1121   :  { %v224_v27 = vpop.f32.mrf.mxu0 }
0x1186   :  { %v912_v8 = vpop.f32.mrf.mxu1 }
0x1187   :  { %v916_v40 = vadd.f32 %v912_v8, %v224_v27 }
0x1188   :  { %v1470_v41 = vpop.f32.mrf.mxu1 }
0x1189   :  { %1588 = vtanh.f32 %v916_v40  ;;  %v1258_v9 = vmul.f32 -1.442695, %v916_v40 }
0x118b   :  { %1590 = vpow2.f32 %v1258_v9 }
0x1196   :  { %v1589_v42 = vpop.eup %1588 }
0x1197   :  { %926 = vrot.lane.b32.xlu0 %v1589_v42, %s1656_s2 }
0x1198   :  { %v1591_v43 = vpop.eup %1590 }
0x1199   :  { %v920_v44 = vadd.f32 1.0, %v1591_v43 }
0x119b   :  { %1592 = vrcp.f32 %v920_v44 }
0x11a8   :  { %v1593_v11 = vpop.eup %1592 }
0x11a9   :  { %v924_v13 = vmul.f32 %v1593_v11, %v833_v31 }
0x1209   :  { %v927_v45 = vpop.permute.xlu0 %926 }
0x120a   :  { %v929_v46 = vmul.f32 %v1593_v11, %v927_v45 }
0x120c   :  { %931 = vrot.lane.b32.xlu1 %v929_v46, %s1656_s2 }
0x127e   :  { %v932_v47 = vpop.permute.xlu1 %931 }
0x127f   :  { %v934_v48 = vadd.f32 %v932_v47, %v924_v13 }
0x1281   :  { %1594 = vtanh.f32 %v934_v48 }
0x128e   :  { %v1595_v49 = vpop.eup %1594 }
0x128f   :  { %937 = vrot.lane.b32.xlu0 %v1595_v49, %s1656_s2 }
0x1301   :  { %v938_v50 = vpop.permute.xlu0 %937 }
0x1302   :  { %v940_v51 = vmul.f32 %v1593_v11, %v938_v50 }
0x1304   :  { %v941_v52 = vmax.f32 %v840_v37, %v940_v51  ;;  %943 = vrot.lane.b32.xlu1 %v940_v51, %s1657_s23 }
0x1376   :  { %v944_v53 = vpop.permute.xlu1 %943 }
0x1377   :  { %1480 = vmatmul.mubr.msk.f32.vlgmr.msra.gmra.mxu1 %vm237_vm3, %v944_v53 }
0x1378   :  { %1490 = vmatprep.mubr.msk.f32.mxu1 %vm1654_vm0, %v1653_v1  ;;  %1483 = vmatpush3.msra.mxu1 %v1046_v4 }
0x1379   :  { %1484 = vmatprep.subr.mxu1 %v1653_v1 }
0x137a   :  { %1485 = vmatpush3.msra.mxu1 %v1045_v5 }
0x137b   :  { %1486 = vmatprep.subr.mxu1 %v1653_v1 }
0x137c   :  { %1487 = vmatpush3.msra.mxu1 %v1044_v6 }
0x137d   :  { %1488 = vmatprep.subr.mxu1 %v1653_v1 }
0x137e   :  { %1489 = vmatpush3.msra.mxu1 %v1043_v7 }
0x1437   :  { %v1013_v54 = vpop.f32.mrf.mxu1 }
0x1438   :  { %v1017_v55 = vadd.f32 %v1393_v25, %v1013_v54  ;;  %v1263_v25 = vld [vmem:[%s1948_s6] ss:$0 sm:$0xff] }
0x1439   :  { %v1481_v56 = vpop.f32.mrf.mxu1 }
0x143a   :  { %1596 = vtanh.f32 %v1017_v55  ;;  %v1260_v58 = vmul.f32 -1.442695, %v1017_v55 }
0x143c   :  { %1598 = vpow2.f32 %v1260_v58 }
0x1447   :  { %v1597_v57 = vpop.eup %1596 }
0x1448   :  { %1027 = vrot.lane.b32.xlu0 %v1597_v57, %s1656_s2 }
0x1449   :  { %v1599_v59 = vpop.eup %1598 }
0x144a   :  { %v1021_v60 = vadd.f32 1.0, %v1599_v59 }
0x144c   :  { %1600 = vrcp.f32 %v1021_v60 }
0x1459   :  { %v1601_v61 = vpop.eup %1600 }
0x145a   :  { %v1025_v0 = vmul.f32 %v1601_v61, %v934_v48 }
0x14ba   :  { %v1028_v62 = vpop.permute.xlu0 %1027 }
0x14bb   :  { %v1030_v63 = vmul.f32 %v1601_v61, %v1028_v62 }
0x14bd   :  { %1032 = vrot.lane.b32.xlu1 %v1030_v63, %s1656_s2 }
0x152f   :  { %v1033_v2 = vpop.permute.xlu1 %1032 }
0x1530   :  { %v1035_v3 = vadd.f32 %v1033_v2, %v1025_v0 }
0x1532   :  { %1602 = vtanh.f32 %v1035_v3 }
0x153f   :  { %v1603_v10 = vpop.eup %1602 }
0x1540   :  { %1038 = vrot.lane.b32.xlu0 %v1603_v10, %s1656_s2 }
0x15b2   :  { %v1039_v18 = vpop.permute.xlu0 %1038 }
0x15b3   :  { %v1041_v20 = vmul.f32 %v1601_v61, %v1039_v18 }
0x15b5   :  { %v1042_v22 = vmax.f32 %v941_v52, %v1041_v20 }
0x15b7   :  { %1055 = vrot.lane.b32.xlu1 %v1042_v22, %s1657_s23 }
0x1629   :  { %v1056_v31 = vpop.permute.xlu1 %1055 }
0x162a   :  { %1491 = vmatmul.mubr.msk.f32.vlgmr.msra.gmra.mxu1 %vm237_vm3, %v1056_v31 }
0x16ea   :  { %v1125_v36 = vpop.f32.mrf.mxu1 }
0x16eb   :  { %v1126_v37 = vadd.f32 %v1261_v35, %v1125_v36 }
0x16ec   :  { %v1492_v38 = vpop.f32.mrf.mxu1 }
0x16ed   :  { %v1129_v39 = vmax.f32 %v1126_v37, 0.0 }
0x16ef   :  { %1526 = vmatmul.mubr.f32.vlgmr.msra.gmra.mxu0 %v1129_v39 }
0x17af   :  { %v1219_v27 = vpop.f32.mrf.mxu0 }
0x17b0   :  { %v1220_v8 = vadd.f32 %v1263_v25, %v1219_v27 }
0x17b1   :  { %v1527_v40 = vpop.f32.mrf.mxu0 }
0x17b2   :  { %1223 = vst [vmem:[%s1949_s7] sm:$0xff] %v1220_v8 }
0x17b3   :  { %1228 = vsyncpa [#allocation3], 1 }
0x17b4   :  { %1229 = vsyncpa [#allocation5], 1 }

</bundles_post_ra>
